<compile_context>
chip_gen: v7x
topology: tpu7x:2x2x1
jax: 0.10.0
libtpu: 0.0.40
codegen_flags: <defaults>
</compile_context>

<pallas_src>
import functools
import math

import jax
import jax.numpy as jnp
from jax import lax
from jax.experimental import pallas as pl
from jax.experimental.pallas import tpu as pltpu


_INV_SQRT2 = 1.0 / math.sqrt(2.0)
_SQRT_2_OVER_PI = math.sqrt(2.0 / math.pi)


def _round_up(x, m):
    return ((x + m - 1) // m) * m


def _sublane_granule(dtype):
    # Sub-32-bit dtypes pack along sublanes: 8 rows per vreg for 4-byte
    # elements, 16 for 2-byte (bf16), 32 for 1-byte (int8/fp8).
    itemsize = jnp.dtype(dtype).itemsize
    return 8 * max(1, 4 // itemsize)


def _erf_mosaic(x):
    # Abramowitz & Stegun 7.1.26 rational approximation (max abs err ~1.5e-7),
    # built only from primitives guaranteed to lower in Mosaic
    # (compare / select / exp / mul / add / div).
    a1, a2, a3, a4, a5 = (0.254829592, -0.284496736, 1.421413741,
                          -1.453152027, 1.061405429)
    p = 0.3275911
    neg = x < 0.0
    ax = jnp.where(neg, -x, x)
    t = 1.0 / (1.0 + p * ax)
    poly = ((((a5 * t + a4) * t + a3) * t + a2) * t + a1) * t
    y = 1.0 - poly * jnp.exp(-ax * ax)
    return jnp.where(neg, -y, y)


def _classifier_kernel(x_ref, w1_ref, b1_ref, w2_ref, b2_ref, out_ref, *,
                       approximate_gelu):
    # Dropout is identity in eval mode.
    # TODO(synk): training-mode stochastic dropout (pltpu.prng_seed +
    # pltpu.stateful_bernoulli) is not implemented here.
    x = x_ref[...]                                      # native dtype (f32 / bf16)

    # dense: [tm, K] @ [K, Np] with f32 accumulation on the MXU.
    h = jnp.dot(x, w1_ref[...], preferred_element_type=jnp.float32)
    h = h + b1_ref[...].astype(jnp.float32)             # b1 is [1, Np]

    if approximate_gelu:
        # tanh-approx GELU (EUP transcendental, frees VALU slots).
        inner = _SQRT_2_OVER_PI * (h + 0.044715 * h * h * h)
        h = 0.5 * h * (1.0 + jnp.tanh(inner))
    else:
        # erf-based GELU: matches PyTorch F.gelu default (to ~1.5e-7).
        h = 0.5 * h * (1.0 + _erf_mosaic(h * _INV_SQRT2))

    # final_dense: [tm, Np] @ [Np, Lp] with f32 accumulation.
    logits = jnp.dot(h.astype(w2_ref.dtype), w2_ref[...],
                     preferred_element_type=jnp.float32)
    logits = logits + b2_ref[...].astype(jnp.float32)   # b2 is [1, Lp]

    out_ref[...] = logits.astype(out_ref.dtype)


def enhanced_classifier(x, w1, b1, w2, b2, *, tile_m=512, small_batch_max=256,
                        approximate_gelu=False):
    """Fused dropout(eval) -> dense -> GELU -> final_dense.

    x : [B, K]     (K = 4 * classifier_hidden_size)
    w1: [K, N1]    b1: [N1]     (N1 = classifier_hidden_size * args.hidden)
    w2: [N1, L]    b2: [L]
    Returns logits [B, L] in x.dtype. Operands are fed to the MXU in their
    native dtype (pass bf16 x / weights to halve DMA traffic if acceptable).
    """
    B, K = x.shape
    N1 = w1.shape[1]
    L = w2.shape[1]
    assert w1.shape[0] == K and w2.shape[0] == N1
    assert b1.shape == (N1,) and b2.shape == (L,)

    out_dtype = x.dtype

    # --- Pad hidden (N1) and label (L) dims to lane multiples of 128 so both
    # GEMMs fill the MXU and output stores are lane-dense. Zero padding is
    # numerically free: padded h columns are gelu(0 + 0) = 0 and the padded
    # w2 rows/cols are zero.
    Np = _round_up(N1, 128)
    Lp = _round_up(L, 128)
    if Np != N1:
        w1 = jnp.zeros((K, Np), w1.dtype).at[:, :N1].set(w1)
        b1 = jnp.zeros((Np,), b1.dtype).at[:N1].set(b1)
        w2 = jnp.zeros((Np, w2.shape[1]), w2.dtype).at[:N1, :].set(w2)
    if Lp != L:
        w2 = jnp.zeros((w2.shape[0], Lp), w2.dtype).at[:, :L].set(w2)
        b2 = jnp.zeros((Lp,), b2.dtype).at[:L].set(b2)
    b1_2d = b1.reshape(1, Np)
    b2_2d = b2.reshape(1, Lp)

    kernel = functools.partial(_classifier_kernel,
                               approximate_gelu=approximate_gelu)

    w_itemsize = jnp.dtype(w1.dtype).itemsize
    weight_bytes = (K * Np + Np * Lp) * w_itemsize \
        + (Np + Lp) * jnp.dtype(b1.dtype).itemsize
    # TODO(synk): if weight_bytes exceeds ~half of v7x's 64 MiB per-TC VMEM,
    # switch to an N1/K-tiled reduction grid with an f32 VMEM accumulator
    # (pl.when init/finalize) instead of keeping both weights fully resident.

    sub = _sublane_granule(x.dtype)
    out_itemsize = jnp.dtype(out_dtype).itemsize
    x_itemsize = jnp.dtype(x.dtype).itemsize

    def cost(bp):
        return pl.CostEstimate(
            flops=2 * bp * K * Np + 2 * bp * Np * Lp,
            transcendentals=bp * Np,
            bytes_accessed=int(bp * K * x_itemsize + weight_bytes
                               + bp * Lp * out_itemsize),
        )

    if B <= small_batch_max:
        # Latency path: single invocation, no grid, everything pinned in VMEM
        # (no pointless double-buffering). Pad B to the dtype-aware sublane
        # granule so the whole-array tile keeps a packed layout.
        Bp = max(sub, _round_up(B, sub))
        xp = x if Bp == B else jnp.zeros((Bp, K), x.dtype).at[:B].set(x)
        act_bytes = Bp * K * x_itemsize + Bp * Np * 4 + Bp * Lp * out_itemsize
        vmem_limit = int(min(64 << 20,
                             max(32 << 20,
                                 2 * (weight_bytes + act_bytes) + (4 << 20))))
        vmem = pl.BlockSpec(memory_space=pltpu.MemorySpace.VMEM)
        out = pl.pallas_call(
            kernel,
            out_shape=jax.ShapeDtypeStruct((Bp, Lp), out_dtype),
            in_specs=[vmem, vmem, vmem, vmem, vmem],
            out_specs=vmem,
            compiler_params=pltpu.CompilerParams(vmem_limit_bytes=vmem_limit),
            cost_estimate=cost(Bp),
        )(xp, w1, b1_2d, w2, b2_2d)
        return out if (Bp == B and Lp == L) else out[:B, :L]

    # Throughput path: grid over batch tiles. Weights/biases have constant
    # index maps + single buffering (fetched once, VMEM-resident); x/out tiles
    # are double-buffered. Tile is large (default up to 512 rows, multiple of
    # the sublane granule) but chosen so the grid length stays >= 2 to keep
    # both v7x TensorCores busy on the "parallel" batch axis.
    tm = max(sub, min(_round_up(tile_m, sub), _round_up(pl.cdiv(B, 2), sub)))
    Bp = _round_up(B, tm)
    grid_len = Bp // tm
    xp = x if Bp == B else jnp.zeros((Bp, K), x.dtype).at[:B].set(x)

    tile_bytes = tm * K * x_itemsize + tm * Lp * out_itemsize   # x tile + out tile
    compute_bytes = tm * Np * 4 * 2                             # f32 h / logits live values
    vmem_limit = int(min(64 << 20,
                         max(32 << 20,
                             2 * tile_bytes + weight_bytes + compute_bytes
                             + (4 << 20))))

    resident = dict(pipeline_mode=pl.Buffered(1))   # fetched once, stays put
    out = pl.pallas_call(
        kernel,
        out_shape=jax.ShapeDtypeStruct((Bp, Lp), out_dtype),
        grid=(grid_len,),
        in_specs=[
            pl.BlockSpec((tm, K), lambda i: (i, 0)),
            pl.BlockSpec((K, Np), lambda i: (0, 0), **resident),
            pl.BlockSpec((1, Np), lambda i: (0, 0), **resident),
            pl.BlockSpec((Np, Lp), lambda i: (0, 0), **resident),
            pl.BlockSpec((1, Lp), lambda i: (0, 0), **resident),
        ],
        out_specs=pl.BlockSpec((tm, Lp), lambda i: (i, 0)),
        compiler_params=pltpu.CompilerParams(
            dimension_semantics=("parallel",),
            vmem_limit_bytes=vmem_limit),
        cost_estimate=cost(Bp),
    )(xp, w1, b1_2d, w2, b2_2d)
    return out if (Bp == B and Lp == L) else out[:B, :L]


def _torch_like_linear_init(key, fan_in, fan_out, dtype=jnp.float32):
    # Deterministic stand-in for nn.Linear default init (uniform +/- 1/sqrt(fan_in)).
    kw, kb = jax.random.split(key)
    bound = 1.0 / math.sqrt(fan_in)
    w = jax.random.uniform(kw, (fan_in, fan_out), dtype, -bound, bound)
    b = jax.random.uniform(kb, (fan_out,), dtype, -bound, bound)
    return w, b


if __name__ == "__main__":
    # args.classifier_hidden_size = 32, args.hidden = 2, num_label = 8
    H = 32
    HIDDEN = 2
    NUM_LABEL = 8
    B_SMALL = 8      # latency / gridless path
    B_LARGE = 1024   # throughput / batched grid path (grid of 2 tiles)

    key = jax.random.PRNGKey(0)
    kx, k1, k2, kb = jax.random.split(key, 4)

    x = jax.random.normal(kx, (B_SMALL, 4 * H), jnp.float32)
    w1, b1 = _torch_like_linear_init(k1, 4 * H, H * HIDDEN)      # dense
    w2, b2 = _torch_like_linear_init(k2, H * HIDDEN, NUM_LABEL)  # final_dense

    def ref_fn(xin):
        h = xin @ w1 + b1
        h = 0.5 * h * (1.0 + lax.erf(h / math.sqrt(2.0)))        # exact F.gelu
        return h @ w2 + b2

    # Small-batch (gridless, fully VMEM-resident) latency path.
    logits = enhanced_classifier(x, w1, b1, w2, b2)
    jax.block_until_ready(logits)
    assert logits.shape == (B_SMALL, NUM_LABEL)
    assert jnp.allclose(logits, ref_fn(x), atol=1e-3, rtol=1e-3), "mismatch (small)"

    # Batched path (grid over batch tiles, parallel axis, resident weights).
    xb = jax.random.normal(kb, (B_LARGE, 4 * H), jnp.float32)
    logits_b = enhanced_classifier(xb, w1, b1, w2, b2)
    jax.block_until_ready(logits_b)
    assert logits_b.shape == (B_LARGE, NUM_LABEL)
    assert jnp.allclose(logits_b, ref_fn(xb), atol=1e-3, rtol=1e-3), "mismatch (batched)"

    print("KERNEL_OK")
</pallas_src>

<mosaic_0001>
module attributes {stable_mosaic.version = 11 : i64} {
  func.func @_classifier_kernel(%arg0: memref<8x128xf32, #tpu.memory_space<vmem>>, %arg1: memref<128x128xf32, #tpu.memory_space<vmem>>, %arg2: memref<1x128xf32, #tpu.memory_space<vmem>>, %arg3: memref<128x128xf32, #tpu.memory_space<vmem>>, %arg4: memref<1x128xf32, #tpu.memory_space<vmem>>, %arg5: memref<8x128xf32, #tpu.memory_space<vmem>>) attributes {dimension_semantics = [], scalar_prefetch = 0 : i64, scratch_operands = 0 : i64, tpu.core_type = #tpu.core_type<tc>} {
    %c0 = arith.constant 0 : index
    %c0_0 = arith.constant 0 : index
    %0 = vector.load %arg0[%c0, %c0_0] : memref<8x128xf32, #tpu.memory_space<vmem>>, vector<8x128xf32>
    %c0_1 = arith.constant 0 : index
    %c0_2 = arith.constant 0 : index
    %1 = vector.load %arg1[%c0_1, %c0_2] : memref<128x128xf32, #tpu.memory_space<vmem>>, vector<128x128xf32>
    %cst = arith.constant dense<0.000000e+00> : vector<8x128xf32>
    %2 = tpu.matmul %0, %1, %cst {dimension_numbers = #tpu.dot_dimension_numbers<[1], [0], [0], [1], [0, 0, 1, 1], [], []>} : vector<8x128xf32>, vector<128x128xf32>, vector<8x128xf32> -> vector<8x128xf32>
    %c0_3 = arith.constant 0 : index
    %c0_4 = arith.constant 0 : index
    %3 = vector.load %arg2[%c0_3, %c0_4] : memref<1x128xf32, #tpu.memory_space<vmem>>, vector<1x128xf32>
    %4 = vector.broadcast %3 : vector<1x128xf32> to vector<8x128xf32>
    %5 = arith.addf %2, %4 : vector<8x128xf32>
    %cst_5 = arith.constant 5.000000e-01 : f32
    %6 = vector.broadcast %cst_5 : f32 to vector<8x128xf32>
    %7 = arith.mulf %6, %5 : vector<8x128xf32>
    %cst_6 = arith.constant 0.707106769 : f32
    %8 = vector.broadcast %cst_6 : f32 to vector<8x128xf32>
    %9 = arith.mulf %5, %8 : vector<8x128xf32>
    %cst_7 = arith.constant 0.000000e+00 : f32
    %10 = vector.broadcast %cst_7 : f32 to vector<8x128xf32>
    %11 = arith.cmpf olt, %9, %10 : vector<8x128xf32>
    %cst_8 = arith.constant 0.000000e+00 : f32
    %12 = vector.broadcast %cst_8 : f32 to vector<8x128xf32>
    %13 = arith.subf %12, %9 : vector<8x128xf32>
    %14 = arith.select %11, %13, %9 : vector<8x128xi1>, vector<8x128xf32>
    %cst_9 = arith.constant 0.327591091 : f32
    %15 = vector.broadcast %cst_9 : f32 to vector<8x128xf32>
    %16 = arith.mulf %15, %14 : vector<8x128xf32>
    %cst_10 = arith.constant 1.000000e+00 : f32
    %17 = vector.broadcast %cst_10 : f32 to vector<8x128xf32>
    %18 = arith.addf %17, %16 : vector<8x128xf32>
    %cst_11 = arith.constant 1.000000e+00 : f32
    %19 = vector.broadcast %cst_11 : f32 to vector<8x128xf32>
    %20 = arith.divf %19, %18 : vector<8x128xf32>
    %cst_12 = arith.constant 1.06140542 : f32
    %21 = vector.broadcast %cst_12 : f32 to vector<8x128xf32>
    %22 = arith.mulf %21, %20 : vector<8x128xf32>
    %cst_13 = arith.constant -1.45315206 : f32
    %23 = vector.broadcast %cst_13 : f32 to vector<8x128xf32>
    %24 = arith.addf %22, %23 : vector<8x128xf32>
    %25 = arith.mulf %24, %20 : vector<8x128xf32>
    %cst_14 = arith.constant 1.42141378 : f32
    %26 = vector.broadcast %cst_14 : f32 to vector<8x128xf32>
    %27 = arith.addf %25, %26 : vector<8x128xf32>
    %28 = arith.mulf %27, %20 : vector<8x128xf32>
    %cst_15 = arith.constant -0.284496725 : f32
    %29 = vector.broadcast %cst_15 : f32 to vector<8x128xf32>
    %30 = arith.addf %28, %29 : vector<8x128xf32>
    %31 = arith.mulf %30, %20 : vector<8x128xf32>
    %cst_16 = arith.constant 0.254829586 : f32
    %32 = vector.broadcast %cst_16 : f32 to vector<8x128xf32>
    %33 = arith.addf %31, %32 : vector<8x128xf32>
    %34 = arith.mulf %33, %20 : vector<8x128xf32>
    %cst_17 = arith.constant 0.000000e+00 : f32
    %35 = vector.broadcast %cst_17 : f32 to vector<8x128xf32>
    %36 = arith.subf %35, %14 : vector<8x128xf32>
    %37 = arith.mulf %36, %14 : vector<8x128xf32>
    %38 = math.exp %37 : vector<8x128xf32>
    %39 = arith.mulf %34, %38 : vector<8x128xf32>
    %cst_18 = arith.constant 1.000000e+00 : f32
    %40 = vector.broadcast %cst_18 : f32 to vector<8x128xf32>
    %41 = arith.subf %40, %39 : vector<8x128xf32>
    %cst_19 = arith.constant 0.000000e+00 : f32
    %42 = vector.broadcast %cst_19 : f32 to vector<8x128xf32>
    %43 = arith.subf %42, %41 : vector<8x128xf32>
    %44 = arith.select %11, %43, %41 : vector<8x128xi1>, vector<8x128xf32>
    %cst_20 = arith.constant 1.000000e+00 : f32
    %45 = vector.broadcast %cst_20 : f32 to vector<8x128xf32>
    %46 = arith.addf %45, %44 : vector<8x128xf32>
    %47 = arith.mulf %7, %46 : vector<8x128xf32>
    %c0_21 = arith.constant 0 : index
    %c0_22 = arith.constant 0 : index
    %48 = vector.load %arg3[%c0_21, %c0_22] : memref<128x128xf32, #tpu.memory_space<vmem>>, vector<128x128xf32>
    %cst_23 = arith.constant dense<0.000000e+00> : vector<8x128xf32>
    %49 = tpu.matmul %47, %48, %cst_23 {dimension_numbers = #tpu.dot_dimension_numbers<[1], [0], [0], [1], [0, 0, 1, 1], [], []>} : vector<8x128xf32>, vector<128x128xf32>, vector<8x128xf32> -> vector<8x128xf32>
    %c0_24 = arith.constant 0 : index
    %c0_25 = arith.constant 0 : index
    %50 = vector.load %arg4[%c0_24, %c0_25] : memref<1x128xf32, #tpu.memory_space<vmem>>, vector<1x128xf32>
    %51 = vector.broadcast %50 : vector<1x128xf32> to vector<8x128xf32>
    %52 = arith.addf %49, %51 : vector<8x128xf32>
    %c0_26 = arith.constant 0 : index
    %c0_27 = arith.constant 0 : index
    %53 = vector.load %arg5[%c0_26, %c0_27] : memref<8x128xf32, #tpu.memory_space<vmem>>, vector<8x128xf32>
    tpu.vector_store %arg5[%c0_26, %c0_27], %52 {strides = array<i32>} : memref<8x128xf32, #tpu.memory_space<vmem>>, vector<8x128xf32>,
    return
  }
}

</mosaic_0001>

<bundles_post_ra>
// kernel: tpu_custom_call.1
= control target key start
LH: loop header
LB: loop body
LE: loop exit
PB: predicated region body
PF: predicated region fallthrough
CT: control target
= control target key end

     0   :  { %10 = vsyncpa [#allocation3], 0  ;;  %s670_s0 = inlined_call_operand.hbm [shape: f32[8,128], index: 0, kind: input, shape index: {}]   ;;  %s671_s1 = inlined_call_operand.hbm [shape: f32[128,128], index: 1, kind: input, shape index: {}]   ;;  %s672_s2 = inlined_call_operand.vmem [shape: f32[1,128], index: 2, kind: input, shape index: {}]   ;;  %s673_s3 = inlined_call_operand.hbm [shape: f32[128,128], index: 3, kind: input, shape index: {}]   ;;  %s674_s4 = inlined_call_operand.vmem [shape: f32[1,128], index: 4, kind: input, shape index: {}]   ;;  %s675_s5 = inlined_call_operand.hbm [shape: f32[8,128], index: 5, kind: output, shape index: {}]  }
   0x1   :  { %11 = vsyncpa [#allocation6], 0 }
   0x2   :  { %12 = vsyncpa [#allocation4], 0  ;;  %s553_s18 = smov [#allocation5]   ;;  %s459_s22 = scalar_lea.hbm %s671_s1, 2048 }
   0x3   :  { %s28_s19 = sshll.u32 %s553_s18, 4  ;;  %p460_p0 = scmp.ne.s32.totalorder %s671_s1, %s459_s22  ;;  %s29_s19 = int_to_ptr.vmem [resolvable:$true] %s28_s19 }
   0x4   :  { %p463_p1 = scmp.lt.u32.totalorder %s459_s22, %s671_s1 }
   0x6   :  { %p465_p2 = pnand %p463_p1, %p460_p0 }
   0x8   :  { %468 = shalt.err (!%p465_p2)
}
   0x9   :  { %s469_s27 = scalar_lea.vmem %s29_s19, 2048  ;;  %p474_p4 = scmp.lt.s32.totalorder %s29_s19, %s29_s19 }
   0xa   :  { %p470_p3 = scmp.ne.s32.totalorder %s29_s19, %s469_s27  ;;  %p475_p5 = scmp.lt.s32.totalorder %s469_s27, %s469_s27 }
   0xc   :  { %p476_p6 = por %p475_p5, %p474_p4 }
   0xe   :  { %p477_p7 = pnand %p476_p6, %p470_p3 }
  0x10   :  { %480 = shalt.err (!%p477_p7)
}
  0x11   :  { %s554_s28 = smov 128   ;;  %s555_s29 = smov 8  }
  0x12   :  { %34 = dma.hbm_to_vmem [thread:$0]  %s671_s1, 2048, %s29_s19, [#allocation6], %s554_s28, %s554_s28, %s555_s29  }
  0x13   :  { %s556_s7 = smov [#allocation2]   ;;  %s557_s9 = smov [#allocation7]  }
  0x14   :  { %s19_s8 = sshll.u32 %s556_s7, 4  ;;  %s42_s10 = sshll.u32 %s557_s9, 4  ;;  %s20_s8 = int_to_ptr.vmem [resolvable:$true] %s19_s8  ;;  %s43_s10 = int_to_ptr.vmem [resolvable:$true] %s42_s10 }
  0x15   :  { %s481_s13 = scalar_lea.hbm %s670_s0, 128 }
  0x16   :  { %p482_p8 = scmp.ne.s32.totalorder %s670_s0, %s481_s13  ;;  %p485_p9 = scmp.lt.u32.totalorder %s481_s13, %s670_s0 }
  0x18   :  { %p487_p10 = pnand %p485_p9, %p482_p8 }
  0x1a   :  { %490 = shalt.err (!%p487_p10)
}
  0x1b   :  { %s491_s1 = scalar_lea.vmem %s20_s8, 128  ;;  %p496_p12 = scmp.lt.s32.totalorder %s20_s8, %s20_s8 }
  0x1c   :  { %p492_p11 = scmp.ne.s32.totalorder %s20_s8, %s491_s1  ;;  %p497_p13 = scmp.lt.s32.totalorder %s491_s1, %s491_s1 }
  0x1e   :  { %p498_p0 = por %p497_p13, %p496_p12 }
  0x20   :  { %p499_p1 = pnand %p498_p0, %p492_p11 }
  0x22   :  { %502 = shalt.err (!%p499_p1)
}
  0x23   :  { %22 = dma.hbm_to_vmem [thread:$0]  %s670_s0, 128, %s20_s8, [#allocation3]  }
  0x24   :  { %s503_s22 = scalar_lea.hbm %s673_s3, 2048 }
  0x25   :  { %p504_p2 = scmp.ne.s32.totalorder %s673_s3, %s503_s22  ;;  %p507_p3 = scmp.lt.u32.totalorder %s503_s22, %s673_s3 }
  0x27   :  { %p509_p4 = pnand %p507_p3, %p504_p2 }
  0x29   :  { %512 = shalt.err (!%p509_p4)
}
  0x2a   :  { %s513_s27 = scalar_lea.vmem %s43_s10, 2048  ;;  %p518_p6 = scmp.lt.s32.totalorder %s43_s10, %s43_s10 }
  0x2b   :  { %p514_p5 = scmp.ne.s32.totalorder %s43_s10, %s513_s27  ;;  %p519_p7 = scmp.lt.s32.totalorder %s513_s27, %s513_s27 }
  0x2d   :  { %p520_p8 = por %p519_p7, %p518_p6 }
  0x2f   :  { %p521_p9 = pnand %p520_p8, %p514_p5 }
  0x31   :  { %524 = shalt.err (!%p521_p9)
}
  0x32   :  { %48 = dma.hbm_to_vmem [thread:$0]  %s673_s3, 2048, %s43_s10, [#allocation6], %s554_s28, %s554_s28, %s555_s29  }
  0x33   :  { %547 = dma.done.wait [#allocation3], 128  }
  0x34   :  { %548 = vsyncadd [#allocation3], 4294967168 }
  0x35   :  { %549 = dma.done.wait [#allocation6], 4096  }
  0x36   :  { %550 = vsyncadd [#allocation6], 4294963200  ;;  %v558_v0 = vmov 0.0|0.0   ;;  %vm559_vm0 = vmmov 0   ;;  %v560_v1 = vmov 0.0   ;;  %v61_v2 = vld [vmem:[#allocation5] sm:$0xff] }
  0x37   :  { %398 = vmatprep.subr.bf16.mxu0 %v558_v0  ;;  %360 = vmatprep.mubr.msk.f32.mxu0 %vm559_vm0, %v560_v1  ;;  %v62_v3 = vld [vmem:[#allocation5 + $0x8] sm:$0xff]  ;;  %v63_v4 = vld [vmem:[#allocation5 + $0x10] sm:$0xff]  ;;  %v64_v6 = vld [vmem:[#allocation5 + $0x18] sm:$0xff]  ;;  %s561_s6 = smov [#allocation8]  }
  0x38   :  { %422 = vmatprep.subr.bf16.mxu1 %v558_v0  ;;  %395 = vmatprep.mubr.msk.f32.mxu1 %vm559_vm0, %v560_v1  ;;  %v399_v5 = vpack.c.bf16 %v62_v3, %v61_v2  ;;  %v402_v7 = vpack.c.bf16 %v64_v6, %v63_v4  ;;  %v65_v8 = vld [vmem:[#allocation5 + $0x20] sm:$0xff]  ;;  %v66_v9 = vld [vmem:[#allocation5 + $0x28] sm:$0xff]  ;;  %v67_v11 = vld [vmem:[#allocation5 + $0x30] sm:$0xff]  ;;  %s282_s7 = sshll.u32 %s561_s6, 4  ;;  %s283_s7 = int_to_ptr.vmem [resolvable:$true] %s282_s7 }
  0x39   :  { %v405_v10 = vpack.c.bf16 %v66_v9, %v65_v8  ;;  %v68_v12 = vld [vmem:[#allocation5 + $0x38] sm:$0xff]  ;;  %v69_v14 = vld [vmem:[#allocation5 + $0x40] sm:$0xff]  ;;  %v70_v15 = vld [vmem:[#allocation5 + $0x48] sm:$0xff]  ;;  %s525_s8 = scalar_lea.vmem %s283_s7, 128  ;;  %p530_p11 = scmp.lt.s32.totalorder %s283_s7, %s283_s7 }
  0x3a   :  { %400 = vmatpush3.bf16.msra.mxu0 %v399_v5  ;;  %v408_v13 = vpack.c.bf16 %v68_v12, %v67_v11  ;;  %v411_v16 = vpack.c.bf16 %v70_v15, %v69_v14  ;;  %v71_v17 = vld [vmem:[#allocation5 + $0x50] sm:$0xff]  ;;  %v72_v18 = vld [vmem:[#allocation5 + $0x58] sm:$0xff]  ;;  %v73_v20 = vld [vmem:[#allocation5 + $0x60] sm:$0xff]  ;;  %p526_p10 = scmp.ne.s32.totalorder %s283_s7, %s525_s8  ;;  %p531_p12 = scmp.lt.s32.totalorder %s525_s8, %s525_s8 }
  0x3b   :  { %401 = vmatprep.subr.bf16.mxu0 %v558_v0  ;;  %v414_v19 = vpack.c.bf16 %v72_v18, %v71_v17  ;;  %v74_v21 = vld [vmem:[#allocation5 + $0x68] sm:$0xff]  ;;  %v75_v23 = vld [vmem:[#allocation5 + $0x70] sm:$0xff]  ;;  %v76_v24 = vld [vmem:[#allocation5 + $0x78] sm:$0xff] }
  0x3c   :  { %v417_v22 = vpack.c.bf16 %v74_v21, %v73_v20  ;;  %v420_v25 = vpack.c.bf16 %v76_v24, %v75_v23  ;;  %v60_v26 = vld [vmem:[#allocation2] sm:$0xff]  ;;  %v182_v27 = vld [vmem:[#allocation7] sm:$0xff]  ;;  %v183_v28 = vld [vmem:[#allocation7 + $0x8] sm:$0xff]  ;;  %p532_p13 = por %p531_p12, %p530_p11 }
  0x3d   :  { %v184_v29 = vld [vmem:[#allocation7 + $0x10] sm:$0xff]  ;;  %v423_v30 = vpack.c.bf16 %v183_v28, %v182_v27  ;;  %v185_v31 = vld [vmem:[#allocation7 + $0x18] sm:$0xff]  ;;  %v186_v33 = vld [vmem:[#allocation7 + $0x20] sm:$0xff] }
  0x3e   :  { %403 = vmatpush3.bf16.msra.mxu0 %v402_v7  ;;  %v426_v32 = vpack.c.bf16 %v185_v31, %v184_v29  ;;  %v187_v34 = vld [vmem:[#allocation7 + $0x28] sm:$0xff]  ;;  %v188_v36 = vld [vmem:[#allocation7 + $0x30] sm:$0xff]  ;;  %v189_v37 = vld [vmem:[#allocation7 + $0x38] sm:$0xff]  ;;  %p533_p0 = pnand %p532_p13, %p526_p10 }
  0x3f   :  { %404 = vmatprep.subr.bf16.mxu0 %v558_v0  ;;  %424 = vmatpush3.bf16.msra.mxu1 %v423_v30  ;;  %v429_v35 = vpack.c.bf16 %v187_v34, %v186_v33  ;;  %v432_v38 = vpack.c.bf16 %v189_v37, %v188_v36  ;;  %v190_v39 = vld [vmem:[#allocation7 + $0x40] sm:$0xff]  ;;  %v191_v40 = vld [vmem:[#allocation7 + $0x48] sm:$0xff]  ;;  %v192_v42 = vld [vmem:[#allocation7 + $0x50] sm:$0xff] }
  0x40   :  { %425 = vmatprep.subr.bf16.mxu1 %v558_v0  ;;  %v435_v41 = vpack.c.bf16 %v191_v40, %v190_v39  ;;  %v193_v43 = vld [vmem:[#allocation7 + $0x58] sm:$0xff]  ;;  %v194_v45 = vld [vmem:[#allocation7 + $0x60] sm:$0xff]  ;;  %v195_v46 = vld [vmem:[#allocation7 + $0x68] sm:$0xff] }
  0x41   :  { %v438_v44 = vpack.c.bf16 %v193_v43, %v192_v42  ;;  %v441_v47 = vpack.c.bf16 %v195_v46, %v194_v45  ;;  %v196_v48 = vld [vmem:[#allocation7 + $0x70] sm:$0xff]  ;;  %v197_v49 = vld [vmem:[#allocation7 + $0x78] sm:$0xff] }
  0x42   :  { %406 = vmatpush3.bf16.msra.mxu0 %v405_v10  ;;  %v444_v50 = vpack.c.bf16 %v197_v49, %v196_v48  ;;  %v292_v51 = vld [vmem:[%s672_s2] ss:$0 sm:$0xff] }
  0x43   :  { %407 = vmatprep.subr.bf16.mxu0 %v558_v0  ;;  %427 = vmatpush3.bf16.msra.mxu1 %v426_v32  ;;  %v293_v17 = vld [vmem:[%s674_s4] ss:$0 sm:$0xff] }
  0x44   :  { %428 = vmatprep.subr.bf16.mxu1 %v558_v0 }
  0x46   :  { %409 = vmatpush3.bf16.msra.mxu0 %v408_v13 }
  0x47   :  { %410 = vmatprep.subr.bf16.mxu0 %v558_v0  ;;  %430 = vmatpush3.bf16.msra.mxu1 %v429_v35 }
  0x48   :  { %431 = vmatprep.subr.bf16.mxu1 %v558_v0 }
  0x4a   :  { %412 = vmatpush3.bf16.msra.mxu0 %v411_v16 }
  0x4b   :  { %413 = vmatprep.subr.bf16.mxu0 %v558_v0  ;;  %433 = vmatpush3.bf16.msra.mxu1 %v432_v38 }
  0x4c   :  { %434 = vmatprep.subr.bf16.mxu1 %v558_v0 }
  0x4e   :  { %415 = vmatpush3.bf16.msra.mxu0 %v414_v19 }
  0x4f   :  { %416 = vmatprep.subr.bf16.mxu0 %v558_v0  ;;  %436 = vmatpush3.bf16.msra.mxu1 %v435_v41 }
  0x50   :  { %437 = vmatprep.subr.bf16.mxu1 %v558_v0 }
  0x52   :  { %418 = vmatpush3.bf16.msra.mxu0 %v417_v22 }
  0x53   :  { %419 = vmatprep.subr.bf16.mxu0 %v558_v0  ;;  %439 = vmatpush3.bf16.msra.mxu1 %v438_v44 }
  0x54   :  { %440 = vmatprep.subr.bf16.mxu1 %v558_v0 }
  0x56   :  { %421 = vmatpush3.bf16.msra.mxu0 %v420_v25 }
  0x57   :  { %442 = vmatpush3.bf16.msra.mxu1 %v441_v47 }
  0x58   :  { %443 = vmatprep.subr.bf16.mxu1 %v558_v0 }
  0x59   :  { %361 = vmatmul.mubr.f32.vlgmr.msra.gmra.mrb[0].mxu0 %v60_v26 }
  0x5b   :  { %445 = vmatpush3.bf16.msra.mxu1 %v444_v50 }
 0x12c   :  { %v150_v52 = vpop.f32.mrb[0].mxu0 }
 0x12d   :  { %v151_v53 = vadd.f32 %v292_v51, %v150_v52  ;;  %v362_v54 = vpop.f32.mrb[1].mxu0 }
 0x12f   :  { %v155_v55 = vmul.f32 0.70710677, %v151_v53  ;;  %v154_v14 = vmul.f32 0.5, %v151_v53 }
 0x131   :  { %vm156_vm1 = vcmp.lt.f32.partialorder %v155_v55, 0.0  ;;  %v157_v56 = vsub.f32 0.0, %v155_v55 }
 0x133   :  { %v158_v57 = vsel %vm156_vm1, %v157_v56, %v155_v55 }
 0x134   :  { %v159_v58 = vmul.f32 0.3275911, %v158_v57  ;;  %v172_v60 = vsub.f32 0.0, %v158_v57 }
 0x136   :  { %v160_v59 = vadd.f32 1.0, %v159_v58  ;;  %v173_v62 = vmul.f32 %v172_v60, %v158_v57 }
 0x138   :  { %455 = vrcp.f32 %v160_v59  ;;  %v174_v1 = vmul.f32 1.442695, %v173_v62 }
 0x13a   :  { %457 = vpow2.f32 %v174_v1 }
 0x142   :  { %v456_v61 = vpop.eup %455 }
 0x143   :  { %v163_v63 = vmul.f32 1.0614054, %v456_v61 }
 0x144   :  { %v458_v9 = vpop.eup %457 }
 0x145   :  { %v164_v0 = vadd.f32 -1.4531521, %v163_v63 }
 0x147   :  { %v165_v2 = vmul.f32 %v456_v61, %v164_v0 }
 0x149   :  { %v166_v3 = vadd.f32 1.4214138, %v165_v2 }
 0x14b   :  { %v167_v4 = vmul.f32 %v456_v61, %v166_v3 }
 0x14d   :  { %v168_v5 = vadd.f32 -0.28449672, %v167_v4 }
 0x14f   :  { %v169_v6 = vmul.f32 %v456_v61, %v168_v5 }
 0x151   :  { %v170_v7 = vadd.f32 0.2548296, %v169_v6 }
 0x153   :  { %v171_v8 = vmul.f32 %v456_v61, %v170_v7 }
 0x155   :  { %v176_v10 = vmul.f32 %v458_v9, %v171_v8 }
 0x157   :  { %v177_v11 = vsub.f32 1.0, %v176_v10 }
 0x159   :  { %v178_v12 = vsub.f32 0.0, %v177_v11 }
 0x15b   :  { %v179_v13 = vsel %vm156_vm1, %v178_v12, %v177_v11 }
 0x15c   :  { %v180_v15 = vadd.f32 1.0, %v179_v13 }
 0x15e   :  { %v181_v16 = vmul.f32 %v180_v15, %v154_v14 }
 0x160   :  { %396 = vmatmul.mubr.f32.vlgmr.msra.gmra.mrb[0].mxu1 %v181_v16 }
 0x233   :  { %v271_v18 = vpop.f32.mrb[0].mxu1 }
 0x234   :  { %v272_v19 = vadd.f32 %v293_v17, %v271_v18  ;;  %v397_v20 = vpop.f32.mrb[1].mxu1 }
 0x236   :  { %275 = vst [vmem:[#allocation8] sm:$0xff] %v272_v19 }
 0x237   :  { %536 = shalt.err (!%p533_p0)
}
 0x238   :  { %s537_s11 = scalar_lea.hbm %s675_s5, 128 }
 0x239   :  { %p538_p1 = scmp.ne.s32.totalorder %s675_s5, %s537_s11  ;;  %p541_p2 = scmp.lt.u32.totalorder %s537_s11, %s675_s5 }
 0x23b   :  { %p543_p3 = pnand %p541_p2, %p538_p1 }
 0x23d   :  { %546 = shalt.err (!%p543_p3)
}
 0x23e   :  { %285 = dma.vmem_to_hbm [thread:$0]  %s283_s7, 128, %s675_s5, [#allocation4]  }
 0x23f   :  { %551 = dma.done.wait [#allocation4], 128  }
 0x240   :  { %552 = vsyncadd [#allocation4], 4294967168 }
 0x241   :  { %289 = vsyncpa [#allocation3], 1 }
 0x242   :  { %290 = vsyncpa [#allocation6], 1 }
 0x243   :  { %291 = vsyncpa [#allocation4], 1 }

</bundles_post_ra>
